<compile_context>
chip_gen: v5e
topology: v5e:2x2
jax: 0.10.0
libtpu: 0.0.40
codegen_flags: <defaults>
</compile_context>

<pallas_src>
import functools

import jax
import jax.numpy as jnp
from jax import lax
from jax.experimental import pallas as pl
from jax.experimental.pallas import tpu as pltpu

_EPS = 1e-5


def _gep2_kernel(A_ref, V_ref, Wt_ref, b_ref, outA_ref, outV_ref,
                 *, n_nodes, n_rel, batch_block, apply_relu):
    """Processes `batch_block` batch elements per grid step.

    A_ref   : (Bt, N, L*N) f32   node-major adjacency (free reshape of (B,N,L,N))
    V_ref   : (Bt, N, Fin) f32
    Wt_ref  : (Fin, O)     f32   lin_A.weight^T
    b_ref   : (1, O)       f32   lin_A.bias
    outA_ref: (Bt, O, L*O) f32   result_A (relation-major columns)
    outV_ref: (Bt, O, Fin) f32   ReLU(V_emb^T @ V)   (BN applied in wrapper)
    """
    N, L, Bt = n_nodes, n_rel, batch_block
    O = Wt_ref.shape[1]
    Wt = Wt_ref[...]
    bias = b_ref[...]

    for i in range(Bt):                                   # static, small
        V = V_ref[i]                                      # (N, Fin) f32

        # lin_A(V) + softmax over the node axis (dim=1 in PyTorch), all f32.
        logits = jnp.dot(V, Wt, preferred_element_type=jnp.float32) + bias
        mx = jnp.max(logits, axis=0, keepdims=True)
        e = jnp.exp(logits - mx)
        s = jnp.sum(e, axis=0, keepdims=True)
        # EUP approx reciprocal (free slot) + one f32 Newton step -> ~f32 accuracy.
        r = pl.reciprocal(s, approx=True)
        r = r * (2.0 - s * r)
        V_emb = e * r                                     # (N, O) f32

        # result_V (pre-BN): V_emb^T @ V — small, kept f32; optional ReLU.
        rV = lax.dot_general(V_emb, V, (((0,), (0,)), ((), ())),
                             preferred_element_type=jnp.float32)      # (O, Fin)
        if apply_relu:
            rV = jnp.maximum(rV, 0.0)
        outV_ref[i] = rV

        # result_A: lane-dense big matmul first.
        #   T = V_emb^T @ A : (O,N)@(N,L*N) -> (O,L*N)   (output lane dim = L*N)
        # bf16 restricted to MXU operands of this matmul, f32 accumulation.
        # TODO(synk): on v7x an fp8(e4m3) A cast could halve A's footprint again,
        # but needs accuracy validation for downstream consumers.
        V_emb_bf = V_emb.astype(jnp.bfloat16)
        A_bf = A_ref[i].astype(jnp.bfloat16)              # in-kernel cast (VPU)
        T = lax.dot_general(V_emb_bf, A_bf, (((0,), (0,)), ((), ())),
                            preferred_element_type=jnp.float32)       # (O, L*N)
        for l in range(L):                                # static, small (no_A)
            # R_l = T_l @ V_emb : (O,N)@(N,O) -> (O,O); tiny, kept f32.
            R_l = jnp.dot(T[:, l * N:(l + 1) * N], V_emb,
                          preferred_element_type=jnp.float32)
            outA_ref[i, :, l * O:(l + 1) * O] = R_l       # static-slice store


def _pick_batch_block(B, n_nodes, n_rel, budget_bytes=6 * 1024 * 1024):
    """Batch elements per grid step: amortize the ~0.35us/step overhead while
    keeping the double-buffered f32 A block inside a conservative VMEM slice."""
    per_batch = 2 * n_nodes * n_rel * n_nodes * 4         # double-buffered f32 A
    bt = max(1, min(B, budget_bytes // max(per_batch, 1)))
    bt = min(bt, 8)
    if B >= 2:
        bt = min(bt, (B + 1) // 2)   # keep >= 2 grid steps (v7x megacore gets work)
    while B % bt:
        bt -= 1
    return bt


def _vmem_limit_bytes():
    """~3/4 of physical VMEM: 96 MiB on v5e/v6e (128 MiB), 48 MiB on v7x (64 MiB)."""
    cap = 64 * 1024 * 1024
    try:
        cap = int(getattr(pltpu.get_tpu_info(), "vmem_capacity_bytes", cap))
    except Exception:
        pass
    return min(cap * 3 // 4, 100 * 1024 * 1024)


def graph_embed_pooling2(A, V, weight, bias, *, is_relu=True, is_bn=True,
                         batch_block=None):
    """Pallas forward of GraphEmbedPooling2.

    A: (B, N, no_A, N), V: (B, N, Fin), weight: (O, Fin), bias: (O,)
    returns (result_A (B, O, no_A, O), result_V (B, O, Fin))
    """
    B, N, L, N2 = A.shape
    assert N2 == N, "A must be (B, N, no_A, N)"
    Fin = V.shape[-1]
    O = weight.shape[0]

    # Layout plumbing only — no extra HBM pass over A:
    #   * A stays node-major f32; (B,N,L,N)->(B,N,L*N) merges contiguous dims.
    #   * weight pre-transposed so every in-kernel matmul is (M,K)@(K,N).
    A3 = jnp.asarray(A, jnp.float32).reshape(B, N, L * N)
    Vf = jnp.asarray(V, jnp.float32)
    Wt = jnp.asarray(weight, jnp.float32).T                # (Fin, O)
    b2 = jnp.asarray(bias, jnp.float32).reshape(1, O)

    Bt = batch_block or _pick_batch_block(B, N, L)
    grid = (B // Bt,)

    kernel = functools.partial(_gep2_kernel, n_nodes=N, n_rel=L,
                               batch_block=Bt, apply_relu=is_relu)

    outA_flat, rV = pl.pallas_call(
        kernel,
        grid=grid,
        in_specs=[
            pl.BlockSpec((Bt, N, L * N), lambda b: (b, 0, 0)),   # A (f32, node-major)
            pl.BlockSpec((Bt, N, Fin), lambda b: (b, 0, 0)),     # V (f32)
            pl.BlockSpec((Fin, O), lambda b: (0, 0)),            # W^T
            pl.BlockSpec((1, O), lambda b: (0, 0)),              # bias
        ],
        out_specs=(
            pl.BlockSpec((Bt, O, L * O), lambda b: (b, 0, 0)),   # result_A slab
            pl.BlockSpec((Bt, O, Fin), lambda b: (b, 0, 0)),     # relu(Vemb^T V)
        ),
        out_shape=(
            jax.ShapeDtypeStruct((B, O, L * O), jnp.float32),
            jax.ShapeDtypeStruct((B, O, Fin), jnp.float32),
        ),
        compiler_params=pltpu.CompilerParams(
            # megacore split over the batch axis on v7x; near no-op on v5e/v6e
            dimension_semantics=("parallel",),
            vmem_limit_bytes=_vmem_limit_bytes(),
        ),
    )(A3, Vf, Wt, b2)

    result_A = outA_flat.reshape(B, O, L, O)

    # BatchNorm1d(Fin): training-mode stats over (B, O), biased variance,
    # default affine (gamma=1, beta=0).  Cross-batch statistics, so it stays in
    # the wrapper (tiny O(B*O*Fin)) and the batch grid axis remains "parallel".
    # TODO(synk): eval-mode BN (running stats) / learned affine params not modeled.
    if is_bn:
        mu = jnp.mean(rV, axis=(0, 1), keepdims=True)
        var = jnp.mean(jnp.square(rV - mu), axis=(0, 1), keepdims=True)
        result_V = (rV - mu) * lax.rsqrt(var + _EPS)
    else:
        result_V = rV
    return result_A, result_V


# ---------------- pure-JAX reference (exact f32 module semantics) ----------------
def _reference(A, V, weight, bias, *, is_relu=True, is_bn=True):
    B, N, L, _ = A.shape
    O = weight.shape[0]
    hp = lax.Precision.HIGHEST
    Vf = V.astype(jnp.float32)

    logits = jnp.einsum("bnf,of->bno", Vf, weight.astype(jnp.float32), precision=hp)
    logits = logits + bias.astype(jnp.float32)
    V_emb = jax.nn.softmax(logits, axis=1)                           # (B, N, O)

    rV = jnp.einsum("bno,bnf->bof", V_emb, Vf, precision=hp)         # (B, O, Fin)

    A2 = A.astype(jnp.float32).reshape(B, N * L, N)
    t = jnp.einsum("brm,bmo->bro", A2, V_emb, precision=hp)          # (B, N*L, O)
    t = t.reshape(B, N, L * O)
    rA = jnp.einsum("bno,bnk->bok", V_emb, t, precision=hp).reshape(B, O, L, O)

    if is_relu:
        rV = jnp.maximum(rV, 0.0)
    if is_bn:
        mu = rV.mean(axis=(0, 1), keepdims=True)
        var = jnp.square(rV - mu).mean(axis=(0, 1), keepdims=True)
        rV = (rV - mu) * lax.rsqrt(var + _EPS)
    return rA, rV


if __name__ == "__main__":
    # small shapes consistent with the module
    B, N, no_A = 2, 16, 2       # batch, nodes, relations
    Fin, O = 8, 4               # input_features_V, output_features_V

    key = jax.random.PRNGKey(0)
    kA, kV, kW = jax.random.split(key, 3)
    A = jax.random.uniform(kA, (B, N, no_A, N), jnp.float32)
    V = jax.random.normal(kV, (B, N, Fin), jnp.float32)
    weight = (1.0 / (Fin * (no_A + 1)) ** 0.5) * jax.random.normal(kW, (O, Fin), jnp.float32)
    bias = jnp.full((O,), 0.1, jnp.float32)

    result_A, result_V = graph_embed_pooling2(A, V, weight, bias)
    jax.block_until_ready((result_A, result_V))

    ref_A, ref_V = _reference(A, V, weight, bias)
    assert result_A.shape == (B, O, no_A, O) and result_V.shape == (B, O, Fin)
    # result_V path is all-f32 -> tight tolerance; result_A deliberately runs the
    # dominant matmul with bf16 MXU operands -> bf16-level tolerance.
    assert jnp.allclose(result_V, ref_V, atol=2e-3, rtol=2e-3), \
        float(jnp.max(jnp.abs(result_V - ref_V)))
    assert jnp.allclose(result_A, ref_A, atol=1e-2, rtol=1e-2), \
        float(jnp.max(jnp.abs(result_A - ref_A)))

    print("KERNEL_OK")
</pallas_src>

<mosaic_0001>
module attributes {stable_mosaic.version = 11 : i64} {
  func.func @_gep2_kernel(%arg0: i32, %arg1: memref<1x16x32xf32, #tpu.memory_space<vmem>>, %arg2: memref<1x16x8xf32, #tpu.memory_space<vmem>>, %arg3: memref<8x4xf32, #tpu.memory_space<vmem>>, %arg4: memref<1x4xf32, #tpu.memory_space<vmem>>, %arg5: memref<1x4x8xf32, #tpu.memory_space<vmem>>, %arg6: memref<1x4x8xf32, #tpu.memory_space<vmem>>) attributes {dimension_semantics = [#tpu.dimension_semantics<parallel>], iteration_bounds = array<i64: 2>, scalar_prefetch = 0 : i64, scratch_operands = 0 : i64, tpu.core_type = #tpu.core_type<tc>, window_params = [{transform_indices = @transform_0, window_bounds = array<i64: 1, 16, 32>}, {transform_indices = @transform_1, window_bounds = array<i64: 1, 16, 8>}, {pipeline_mode = #tpu.pipeline_mode<synchronous>, transform_indices = @transform_2, window_bounds = array<i64: 8, 4>}, {pipeline_mode = #tpu.pipeline_mode<synchronous>, transform_indices = @transform_3, window_bounds = array<i64: 1, 4>}, {transform_indices = @transform_4, window_bounds = array<i64: 1, 4, 8>}, {transform_indices = @transform_5, window_bounds = array<i64: 1, 4, 8>}]} {
    %c0 = arith.constant 0 : index
    %c0_0 = arith.constant 0 : index
    %0 = vector.load %arg3[%c0, %c0_0] : memref<8x4xf32, #tpu.memory_space<vmem>>, vector<8x4xf32>
    %c0_1 = arith.constant 0 : index
    %c0_2 = arith.constant 0 : index
    %1 = vector.load %arg4[%c0_1, %c0_2] : memref<1x4xf32, #tpu.memory_space<vmem>>, vector<1x4xf32>
    %c0_3 = arith.constant 0 : index
    %c0_4 = arith.constant 0 : index
    %c0_5 = arith.constant 0 : index
    %2 = vector.load %arg2[%c0_3, %c0_4, %c0_5] : memref<1x16x8xf32, #tpu.memory_space<vmem>>, vector<1x16x8xf32>
    %3 = vector.shape_cast %2 : vector<1x16x8xf32> to vector<16x8xf32>
    %cst = arith.constant dense<0.000000e+00> : vector<16x4xf32>
    %4 = tpu.matmul %3, %0, %cst {dimension_numbers = #tpu.dot_dimension_numbers<[1], [0], [0], [1], [0, 0, 1, 1], [], []>} : vector<16x8xf32>, vector<8x4xf32>, vector<16x4xf32> -> vector<16x4xf32>
    %5 = vector.broadcast %1 : vector<1x4xf32> to vector<16x4xf32>
    %6 = arith.addf %4, %5 : vector<16x4xf32>
    %cst_6 = arith.constant dense<0xFF800000> : vector<4xf32>
    %7 = vector.multi_reduction <maximumf>, %6, %cst_6 [0] : vector<16x4xf32> to vector<4xf32>
    %8 = vector.shape_cast %7 : vector<4xf32> to vector<1x4xf32>
    %9 = vector.broadcast %8 : vector<1x4xf32> to vector<16x4xf32>
    %10 = arith.subf %6, %9 : vector<16x4xf32>
    %11 = math.exp %10 : vector<16x4xf32>
    %cst_7 = arith.constant dense<0.000000e+00> : vector<4xf32>
    %12 = vector.multi_reduction <add>, %11, %cst_7 [0] : vector<16x4xf32> to vector<4xf32>
    %13 = vector.shape_cast %12 : vector<4xf32> to vector<1x4xf32>
    %14 = tpu.reciprocal %13 {approx = true} : vector<1x4xf32> -> vector<1x4xf32>
    %15 = arith.mulf %13, %14 : vector<1x4xf32>
    %cst_8 = arith.constant 2.000000e+00 : f32
    %16 = vector.broadcast %cst_8 : f32 to vector<1x4xf32>
    %17 = arith.subf %16, %15 : vector<1x4xf32>
    %18 = arith.mulf %14, %17 : vector<1x4xf32>
    %19 = vector.broadcast %18 : vector<1x4xf32> to vector<16x4xf32>
    %20 = arith.mulf %11, %19 : vector<16x4xf32>
    %cst_9 = arith.constant dense<0.000000e+00> : vector<4x8xf32>
    %21 = tpu.matmul %20, %3, %cst_9 {dimension_numbers = #tpu.dot_dimension_numbers<[0], [0], [1], [1], [0, 1, 1, 1], [], []>} : vector<16x4xf32>, vector<16x8xf32>, vector<4x8xf32> -> vector<4x8xf32>
    %cst_10 = arith.constant 0.000000e+00 : f32
    %22 = vector.broadcast %cst_10 : f32 to vector<4x8xf32>
    %23 = arith.maximumf %21, %22 : vector<4x8xf32>
    %c0_11 = arith.constant 0 : index
    %c0_12 = arith.constant 0 : index
    %c0_13 = arith.constant 0 : index
    %24 = vector.load %arg6[%c0_11, %c0_12, %c0_13] : memref<1x4x8xf32, #tpu.memory_space<vmem>>, vector<1x4x8xf32>
    %25 = vector.shape_cast %24 : vector<1x4x8xf32> to vector<4x8xf32>
    %26 = vector.shape_cast %23 : vector<4x8xf32> to vector<1x4x8xf32>
    tpu.vector_store %arg6[%c0_11, %c0_12, %c0_13], %26 {strides = array<i32>} : memref<1x4x8xf32, #tpu.memory_space<vmem>>, vector<1x4x8xf32>,
    %27 = arith.truncf %20 : vector<16x4xf32> to vector<16x4xbf16>
    %c0_14 = arith.constant 0 : index
    %c0_15 = arith.constant 0 : index
    %c0_16 = arith.constant 0 : index
    %28 = vector.load %arg1[%c0_14, %c0_15, %c0_16] : memref<1x16x32xf32, #tpu.memory_space<vmem>>, vector<1x16x32xf32>
    %29 = vector.shape_cast %28 : vector<1x16x32xf32> to vector<16x32xf32>
    %30 = arith.truncf %29 : vector<16x32xf32> to vector<16x32xbf16>
    %cst_17 = arith.constant dense<0.000000e+00> : vector<4x32xf32>
    %31 = tpu.matmul %27, %30, %cst_17 {dimension_numbers = #tpu.dot_dimension_numbers<[0], [0], [1], [1], [0, 1, 1, 1], [], []>} : vector<16x4xbf16>, vector<16x32xbf16>, vector<4x32xf32> -> vector<4x32xf32>
    %32 = vector.extract_strided_slice %31 {offsets = [0, 0], sizes = [4, 16], strides = [1, 1]} : vector<4x32xf32> to vector<4x16xf32>
    %cst_18 = arith.constant dense<0.000000e+00> : vector<4x4xf32>
    %33 = tpu.matmul %32, %20, %cst_18 {dimension_numbers = #tpu.dot_dimension_numbers<[1], [0], [0], [1], [0, 0, 1, 1], [], []>} : vector<4x16xf32>, vector<16x4xf32>, vector<4x4xf32> -> vector<4x4xf32>
    %c0_19 = arith.constant 0 : index
    %c0_20 = arith.constant 0 : index
    %c0_21 = arith.constant 0 : index
    %34 = vector.load %arg5[%c0_19, %c0_20, %c0_21] : memref<1x4x8xf32, #tpu.memory_space<vmem>>, vector<1x4x4xf32>
    %35 = vector.shape_cast %34 : vector<1x4x4xf32> to vector<4x4xf32>
    %36 = vector.shape_cast %33 : vector<4x4xf32> to vector<1x4x4xf32>
    tpu.vector_store %arg5[%c0_19, %c0_20, %c0_21], %36 {strides = array<i32>} : memref<1x4x8xf32, #tpu.memory_space<vmem>>, vector<1x4x4xf32>,
    %37 = vector.extract_strided_slice %31 {offsets = [0, 16], sizes = [4, 16], strides = [1, 1]} : vector<4x32xf32> to vector<4x16xf32>
    %cst_22 = arith.constant dense<0.000000e+00> : vector<4x4xf32>
    %38 = tpu.matmul %37, %20, %cst_22 {dimension_numbers = #tpu.dot_dimension_numbers<[1], [0], [0], [1], [0, 0, 1, 1], [], []>} : vector<4x16xf32>, vector<16x4xf32>, vector<4x4xf32> -> vector<4x4xf32>
    %c0_23 = arith.constant 0 : index
    %c0_24 = arith.constant 0 : index
    %c4 = arith.constant 4 : index
    %39 = vector.load %arg5[%c0_23, %c0_24, %c4] : memref<1x4x8xf32, #tpu.memory_space<vmem>>, vector<1x4x4xf32>
    %40 = vector.shape_cast %39 : vector<1x4x4xf32> to vector<4x4xf32>
    %41 = vector.shape_cast %38 : vector<4x4xf32> to vector<1x4x4xf32>
    tpu.vector_store %arg5[%c0_23, %c0_24, %c4], %41 {strides = array<i32>} : memref<1x4x8xf32, #tpu.memory_space<vmem>>, vector<1x4x4xf32>,
    return
  }
  func.func @transform_0(%arg0: i32) -> (i32, i32, i32) {
    %c0_i32 = arith.constant 0 : i32
    %c0_i32_0 = arith.constant 0 : i32
    %c0_i32_1 = arith.constant 0 : i32
    return %arg0, %c0_i32, %c0_i32_0 : i32, i32, i32
  }
  func.func @transform_1(%arg0: i32) -> (i32, i32, i32) {
    %c0_i32 = arith.constant 0 : i32
    %c0_i32_0 = arith.constant 0 : i32
    %c0_i32_1 = arith.constant 0 : i32
    return %arg0, %c0_i32, %c0_i32_0 : i32, i32, i32
  }
  func.func @transform_2(%arg0: i32) -> (i32, i32) {
    %c0_i32 = arith.constant 0 : i32
    %c0_i32_0 = arith.constant 0 : i32
    %c0_i32_1 = arith.constant 0 : i32
    return %c0_i32, %c0_i32_0 : i32, i32
  }
  func.func @transform_3(%arg0: i32) -> (i32, i32) {
    %c0_i32 = arith.constant 0 : i32
    %c0_i32_0 = arith.constant 0 : i32
    %c0_i32_1 = arith.constant 0 : i32
    return %c0_i32, %c0_i32_0 : i32, i32
  }
  func.func @transform_4(%arg0: i32) -> (i32, i32, i32) {
    %c0_i32 = arith.constant 0 : i32
    %c0_i32_0 = arith.constant 0 : i32
    %c0_i32_1 = arith.constant 0 : i32
    return %arg0, %c0_i32, %c0_i32_0 : i32, i32, i32
  }
  func.func @transform_5(%arg0: i32) -> (i32, i32, i32) {
    %c0_i32 = arith.constant 0 : i32
    %c0_i32_0 = arith.constant 0 : i32
    %c0_i32_1 = arith.constant 0 : i32
    return %arg0, %c0_i32, %c0_i32_0 : i32, i32, i32
  }
}

</mosaic_0001>

<bundles_post_ra>
// kernel: tpu_custom_call.1
= control target key start
LH: loop header
LB: loop body
LE: loop exit
PB: predicated region body
PF: predicated region fallthrough
CT: control target
= control target key end

     0   :  { %11 = vsyncpa [#allocation3], 0  ;;  %s947_s0 = inlined_call_operand.vmem [shape: f32[2,16,32], index: 0, kind: input, shape index: {}]   ;;  %s948_s1 = inlined_call_operand.vmem [shape: f32[2,16,8], index: 1, kind: input, shape index: {}]   ;;  %s949_s2 = inlined_call_operand.vmem [shape: f32[8,4], index: 2, kind: input, shape index: {}]   ;;  %s950_s3 = inlined_call_operand.vmem [shape: f32[1,4], index: 3, kind: input, shape index: {}]   ;;  %s951_s4 = inlined_call_operand.hbm [shape: f32[2,4,8], index: 4, kind: output, shape index: {0}]   ;;  %s952_s5 = inlined_call_operand.hbm [shape: f32[2,4,8], index: 5, kind: output, shape index: {1}]  }
   0x1   :  { %13 = vsyncpa [#allocation3 + $0x1], 0 }
   0x2   :  { %14 = vsyncpa [#allocation5], 0 }
   0x3   :  { %16 = vsyncpa [#allocation5 + $0x1], 0  ;;  %s819_s18 = smov 0   ;;  %s821_s19 = smov 0  }
   0x4   :  { %s823_s20 = smov 0   ;;  %s825_s21 = smov 0  }
   0x5 LB: > { %s840_s22 = sadd.s32 4294967295, %s785_s21   ;;  %s612_s23 = sadd.s32 4294967294, %s785_s21   ;;  %s785_s21 = sphi %s825_s21, %s958_s21   ;;  %s781_s20 = sphi %s823_s20, %s957_s20   ;;  %s777_s19 = sphi %s821_s19, %s956_s19   ;;  %s773_s18 = sphi %s819_s18, %s955_s18  }
   0x6   : > { %s844_s24 = sadd.s32 1, %s785_s21   ;;  %s123_s25 = sadd.s32 1, %s781_s20 }
   0x7   : > { %s120_s26 = ssub.s32 %s785_s21, %s844_s24  ;;  %p133_p0 = scmp.ne.s32.totalorder %s781_s20, %s777_s19 }
   0x8   : > { %p121_p1 = scmp.eq.s32.totalorder %s120_s26, 0  ;;  %p134_p2 = scmp.eq.s32.totalorder %s840_s22, 1 }
   0x9   : > { %p139_p3 = scmp.ne.s32.totalorder %s777_s19, %s773_s18  ;;  %p140_p4 = scmp.eq.s32.totalorder %s612_s23, 1 }
   0xa   : > { %s855_s27 = scalar_select %p121_p1, %s781_s20, %s123_s25  }
   0xb   : > { %p857_p5 = por %p134_p2, %p133_p0  ;;  %p861_p6 = por %p140_p4, %p139_p3 }
   0xc   : > { %p615_p7 = scmp.ge.s32.totalorder %s785_s21, 1  ;;  %p206_p8 = scmp.lt.s32.totalorder %s785_s21, 3 }
   0xe   : > { %p207_p9 = pnand %p615_p7, %p206_p8 }
   0xf   : > { %p244_p10 = scmp.lt.s32.totalorder (!%p207_p9), %s840_s22, 1  ;;  %s787_s17 = smov (!%p207_p9), 112  }
  0x10   : > { %210 = sbr.rel (%p207_p9) target bundleno = 862 (0x35e), region = 36  ;;  %s893_s23 = sand.u32 (!%p207_p9), 1, %s777_s19  }
  0x11   : > { %s616_s25 = sshll.u32 (!%p207_p9), %s893_s23, 2  ;;  %s630_s30 = sshll.u32 (!%p207_p9), %s840_s22, 2 }
  0x12   : > { %s896_s26 = scalar_lea.vmem (!%p207_p9), [#allocation2], %s616_s25  ;;  %s243_s6 = scalar_lea.vmem (!%p207_p9), [#allocation4], %s616_s25 }
  0x13   : > { %s503_s9 = scalar_lea.hbm (!%p207_p9), %s952_s5, %s630_s30  ;;  %s505_s10 = sshll.u32 (!%p207_p9), %s243_s6, 4  ;;  %s506_s10 = int_to_ptr.vmem [resolvable:$true] %s505_s10 }
  0x14   : > { %s479_s12 = scalar_lea.sflag (!%p207_p9), [#allocation5], %s893_s23 }
  0x15   : > { %v255_v0 = vld [vmem:[%s949_s2] sm:$0xff]  ;;  %s872_s7 = scalar_select %p244_p10, %s840_s22, 1  ;;  %vm262_vm0 = vcmask 64512   ;;  %vm292_vm1 = vcmask 31744   ;;  %vm355_vm2 = vcmask 130048   ;;  %vm441_vm3 = vcmask 27648  }
  0x16   : > { %284 = vmatpush.msra.mxu0 %v255_v0  ;;  %v684_v4 = vld [vmem:[%s950_s3] ss:$0 sm:$0xff]  ;;  %vm380_vm4 = vcmask 60416  }
  0x17   : > { %s634_s8 = sshll.u32 %s872_s7, 4 }
  0x18   : > { %s253_s11 = scalar_lea.vmem %s948_s1, %s634_s8  ;;  %s248_s16 = scalar_lea.vmem %s947_s0, %s634_s8 }
  0x19   : > { %v257_v1 = vld [vmem:[%s253_s11] sm:$0xff]  ;;  %v258_v2 = vld [vmem:[%s253_s11 + $0x8] sm:$0xff]  ;;  %s507_s11 = sshll.u32 %s503_s9, 4  ;;  %s508_s11 = int_to_ptr.hbm [resolvable:$true] %s507_s11 }
  0x1a   : > { %622 = vmatmul.msk.f32.vlgmr.msra.gmra.mxu0 %vm262_vm0, %v257_v1  ;;  %373 = vmatpush.msra.mxu1 %v258_v2  ;;  %v383_v29 = vld [vmem:[%s248_s16] sm:$0xff]  ;;  %v384_v30 = vld [vmem:[%s248_s16 + $0x8] sm:$0xff]  ;;  %s705_s13 = sshra.s32 %s508_s11, 4  ;;  %s711_s16 = scalar_lea.hbm %s952_s5, 8  ;;  %s706_s13 = int_to_ptr.hbm [resolvable:$true] %s705_s13 }
  0x1b   : > { %v385_v31 = vpack.c.bf16 %v384_v30, %v383_v29  ;;  %s707_s14 = scalar_lea.hbm %s706_s13, 4  ;;  %p712_p0 = scmp.lt.s32.totalorder %s706_s13, %s952_s5 }
  0x1c   : > { %374 = vmatpush.msra.mxu1 %v257_v1  ;;  %p708_p11 = scmp.ne.s32.totalorder %s706_s13, %s707_s14  ;;  %p713_p1 = scmp.lt.s32.totalorder %s711_s16, %s707_s14 }
  0x1d   : > { %412 = vmatpush.bf16.msra.mxu2 %v385_v31 }
  0x1e   : > { %p709_p12 = pnand %p708_p11, %p857_p5  ;;  %p714_p2 = por %p713_p1, %p712_p0 }
  0x20   : > { %p710_p13 = pneg %p709_p12 }
  0x22   : > { %623 = vmatmul.msk.f32.gmra.mxu0 %vm262_vm0, %v258_v2  ;;  %p715_p3 = pnand %p714_p2, %p710_p13 }
  0x97   : > { %v286_v3 = vpop.f32.mrf.mxu0 }
  0x98   : > { %v287_v5 = vadd.f32 %v684_v4, %v286_v3 }
  0x9a   : > { %v293_v8 = vsel %vm292_vm1, %v287_v5, -inf }
  0x9f   : > { %v289_v6 = vpop.f32.mrf.mxu0 }
  0xa0   : > { %v290_v7 = vadd.f32 %v684_v4, %v289_v6 }
  0xa2   : > { %v294_v9 = vsel %vm292_vm1, %v290_v7, -inf }
  0xa3   : > { %v295_v10 = vmax.f32 %v293_v8, %v294_v9 }
  0xa5   : > { %v296_v11 = vrot.slane %v295_v10, 4 }
  0xa7   : > { %v297_v12 = vmax.f32 %v295_v10, %v296_v11 }
  0xa9   : > { %v298_v13 = vrot.slane %v297_v12, 2 }
  0xab   : > { %v299_v14 = vmax.f32 %v297_v12, %v298_v13 }
  0xad   : > { %v300_v15 = vrot.slane %v299_v14, 1 }
  0xaf   : > { %v301_v16 = vmax.f32 %v299_v14, %v300_v15 }
  0xb1   : > { %v302_v17 = vsub.f32 %v287_v5, %v301_v16  ;;  %v303_v18 = vsub.f32 %v290_v7, %v301_v16 }
  0xb3   : > { %v304_v19 = vmul.f32 1.442695, %v302_v17  ;;  %v306_v20 = vmul.f32 1.442695, %v303_v18 }
  0xb5   : > { %685 = vpow2.f32 %v304_v19 }
  0xb6   : > { %687 = vpow2.f32 %v306_v20 }
  0xbb   : > { %v686_v21 = vpop.eup %685 }
  0xbc   : > { %v688_v22 = vpop.eup %687  ;;  %v308_v23 = vsel %vm292_vm1, %v686_v21, 0.0 }
  0xbd   : > { %v309_v24 = vsel %vm292_vm1, %v688_v22, 0.0 }
  0xbe   : > { %v310_v25 = vadd.f32 %v309_v24, %v308_v23 }
  0xc0   : > { %v311_v26 = vrot.slane %v310_v25, 4 }
  0xc2   : > { %v312_v27 = vadd.f32 %v311_v26, %v310_v25 }
  0xc4   : > { %v313_v28 = vrot.slane %v312_v27, 2 }
  0xc6   : > { %v314_v32 = vadd.f32 %v313_v28, %v312_v27 }
  0xc8   : > { %v315_v33 = vrot.slane %v314_v32, 1 }
  0xca   : > { %v316_v34 = vadd.f32 %v315_v33, %v314_v32 }
  0xcc   : > { %689 = vrcp.f32 %v316_v34 }
  0xd2   : > { %v690_v35 = vpop.eup %689 }
  0xd3   : > { %v318_v36 = vmul.f32 %v690_v35, %v316_v34 }
  0xd5   : > { %v319_v37 = vsub.f32 2.0, %v318_v36 }
  0xd7   : > { %v320_v38 = vmul.f32 %v690_v35, %v319_v37 }
  0xd9   : > { %v322_v39 = vmul.f32 %v688_v22, %v320_v38  ;;  %v321_v40 = vmul.f32 %v686_v21, %v320_v38 }
  0xdb   : > { %435 = vmatpush.msra.mxu3 %v322_v39  ;;  %461 = vmatpush.msrb.mxu1 %v322_v39  ;;  %v382_v41 = vpack.c.bf16 %v322_v39, %v321_v40 }
  0xdc   : > { %323 = vxpose.xlu1.b32.start [1/2] (short) (narrow) %v321_v40, 8 }
  0xdd   : > { %436 = vmatpush.msra.mxu3 %v321_v40  ;;  %462 = vmatpush.msrb.mxu1 %v321_v40 }
  0xde   : > { %386 = vxpose.xlu0.c.b16.start.end [1/1] (short) (narrow) %v382_v41, 16 }
  0xe4   : > { %324 = vxpose.xlu1.b32.end [2/2] (short) (narrow) %v322_v39, 8 }
 0x180   : > { %v339_v43 = vpop.trf.xlu1 }
 0x181   : > { %624 = vmatmul.msk.f32.vlgmr.msra.gmra.mxu1 %vm355_vm2, %v339_v43 }
 0x18a   : > { %v394_v42 = vpop.trf.xlu0 }
 0x18b   : > { %625 = vmatmul.msk.bf16.vlgmr.msra.gmra.mxu2 %vm355_vm2, %v394_v42 }
 0x1fe   : > { %v376_v48 = vpop.f32.mrf.mxu1 }
 0x1ff   : > { %v379_v49 = vmax.f32 %v376_v48, 0.0 }
 0x201   : > { %381 = vst.msk [vmem:[%s243_s6] sm:$0xf] %vm380_vm4, %v379_v49 }
 0x20e   : > { %v414_v44 = vpop.f32.mrf.mxu2 }
 0x20f   : > { %443 = vrot.lane.b32.xlu0 %v414_v44, %s787_s17  ;;  %626 = vmatmul.msk.f32.vlgmr.msra.gmra.mxu3 %vm355_vm2, %v414_v44 }
 0x216   : > { %v416_v45 = vpop.f32.mrf.mxu2 }
 0x281   : > { %v444_v46 = vpop.permute.xlu0 %443 }
 0x282   : > { %627 = vmatmul.msk.f32.vlgmr.msrb.gmra.mxu1 %vm355_vm2, %v444_v46 }
 0x292   : > { %v438_v47 = vpop.f32.mrf.mxu3 }
 0x293   : > { %442 = vst.msk [vmem:[%s896_s26] sm:$0xf] %vm441_vm3, %v438_v47 }
 0x294   : > { %718 = shalt.err (!%p715_p3)
}
 0x295   : > { %637 = dma.vmem_to_hbm [thread:$0]  (%p857_p5), %s506_s10, 64, %s508_s11, %s479_s12   ;;  %vm471_vm5 = vcmask 60448  }
 0x296   : > { %s788_s6 = smov 4   ;;  %s489_s9 = scalar_lea.hbm %s951_s4, %s630_s30 }
 0x297   : > { %s491_s22 = sshll.u32 %s896_s26, 4  ;;  %s493_s13 = sshll.u32 %s489_s9, 4  ;;  %s492_s22 = int_to_ptr.vmem [resolvable:$true] %s491_s22  ;;  %s494_s13 = int_to_ptr.hbm [resolvable:$true] %s493_s13 }
 0x298   : > { %s474_s14 = scalar_lea.sflag [#allocation3], %s893_s23  ;;  %s733_s15 = sshra.s32 %s494_s13, 4  ;;  %s734_s15 = int_to_ptr.hbm [resolvable:$true] %s733_s15 }
 0x299   : > { %s735_s16 = scalar_lea.hbm %s734_s15, 4  ;;  %s739_s12 = scalar_lea.hbm %s951_s4, 8 }
 0x29a   : > { %p736_p4 = scmp.ne.s32.totalorder %s734_s15, %s735_s16  ;;  %p740_p9 = scmp.lt.s32.totalorder %s734_s15, %s951_s4 }
 0x29b   : > { %p741_p10 = scmp.lt.s32.totalorder %s739_s12, %s735_s16 }
 0x29c   : > { %p737_p7 = pnand %p736_p4, %p857_p5 }
 0x29d   : > { %p742_p11 = por %p741_p10, %p740_p9 }
 0x29e   : > { %p738_p8 = pneg %p737_p7 }
 0x2a0   : > { %p743_p12 = pnand %p742_p11, %p738_p8 }
 0x2ff   : > { %v464_v50 = vpop.f32.mrf.mxu1 }
 0x300   : > { %468 = vrot.lane.b32.xlu2 %v464_v50, %s788_s6 }
 0x35a   : > { %v469_v51 = vpop.permute.xlu2 %468 }
 0x35b   : > { %472 = vst.msk [vmem:[%s896_s26] sm:$0xf] %vm471_vm5, %v469_v51 }
 0x35c   : > { %746 = shalt.err (!%p743_p12)
}
 0x35d   : > { %636 = dma.vmem_to_hbm [thread:$0]  (%p857_p5), %s492_s22, 64, %s494_s13, %s474_s14  }
 0x35e PF: > { %p647_p13 = scmp.ge.s32.totalorder %s785_s21, 2  ;;  %s519_s23 = sand.u32 1, %s773_s18  }
 0x35f   : > { %s520_s26 = scalar_lea.sflag [#allocation3], %s519_s23 }
 0x360   : > { %p641_p0 = pnand %p647_p13, %p861_p6 }
 0x362   : > { %p642_p1 = pneg %p641_p0 }
 0x364   : > { %764 = dma.done.wait (%p642_p1), %s520_s26, 64  }
 0x365   : > { %766 = vsyncadd (%p642_p1), %s520_s26, 4294967232  ;;  %s530_s25 = scalar_lea.sflag [#allocation5], %s519_s23 }
 0x366   : > { %768 = dma.done.wait (%p642_p1), %s530_s25, 64  }
 0x367   : > { %770 = vsyncadd (%p642_p1), %s530_s25, 4294967232  ;;  %p19_p5 = scmp.ge.s32.totalorder %s844_s24, 4   ;;  %s955_s18 = smov %s777_s19 }
 0x368   : > { %s956_s19 = smov %s781_s20  ;;  %s957_s20 = smov %s855_s27 }
 0x369   : > { %s958_s21 = smov %s844_s24  ;;  %21 = sbr.rel (!%p19_p5) target bundleno = 5 (0x5), region = 91 }
 0x36e   :  { %536 = vsyncpa [#allocation3], 1 }
 0x36f   :  { %538 = vsyncpa [#allocation3 + $0x1], 1 }
 0x370   :  { %539 = vsyncpa [#allocation5], 1 }
 0x371   :  { %541 = vsyncpa [#allocation5 + $0x1], 1 }

</bundles_post_ra>
